<compile_context>
chip_gen: v7x
topology: tpu7x:2x2x1
jax: 0.10.0
libtpu: 0.0.40
codegen_flags: <defaults>
</compile_context>

<pallas_src>
import math

import jax
import jax.numpy as jnp
from jax.experimental import pallas as pl
from jax.experimental.pallas import tpu as pltpu  # noqa: F401  (kept for TPU-specific tuning hooks)

# Model hyper-parameters (small, consistent with the module's __init__ signature).
D_MODEL = 32
NUM_HEADS = 4
D_HEAD = D_MODEL // NUM_HEADS
D_HIDDEN = 64
SEQ = 8
BATCH = 2
EPS = 1e-6
NEG_INF = -1e9

# Cast MXU operands to bf16 (f32 accumulation). Weights are pre-cast in pack_params;
# only activations are cast in-kernel; all elementwise work stays f32.
MXU_BF16 = False

# ---- packed "vector slab" layout: one lane-dense (rows, 128) f32 operand ----
N_TOK = BATCH * SEQ                    # flattened (batch, seq) token count
VEC_WIDTH = 128                        # >= max(3*D_MODEL, D_HIDDEN, N_TOK)
(ROW_BQKV, ROW_BO, ROW_G1, ROW_BE1,
 ROW_B1, ROW_B2, ROW_G2, ROW_BE2, ROW_BIAS0) = range(9)
VEC_ROWS = ROW_BIAS0 + N_TOK           # 8 + 16 = 24 rows (multiple of 8)


def encoder_kernel(x_ref, wqkv_ref, wo_ref, wffn_ref, vec_ref, o_ref):
    """Single invocation: whole (B*S, D) problem + all params resident in VMEM."""
    n_tok, d_model = x_ref.shape
    n_heads, d_head, _ = wo_ref.shape
    d_hidden = wffn_ref.shape[2]
    scale = 1.0 / math.sqrt(d_head)

    def mxu(t):  # activations only — weight slabs are already in MXU dtype
        return t.astype(jnp.bfloat16) if MXU_BF16 else t

    x = x_ref[...]                                                     # (N, D) f32

    # ---- fused Q|K|V projection: one lane-dense (N, D) @ (D, 3D) matmul ----
    proj = jnp.dot(mxu(x), wqkv_ref[...], preferred_element_type=jnp.float32)
    proj = proj + vec_ref[ROW_BQKV:ROW_BQKV + 1, 0:3 * d_model]        # [bq | bk | bv]

    # ---- head-major relayout: H lane slices + one stack per tensor ----
    def heads(col0):
        return jnp.stack(
            [proj[:, col0 + h * d_head: col0 + (h + 1) * d_head] for h in range(n_heads)],
            axis=0)                                                    # (H, N, dh)

    qh = heads(0)
    kh = heads(d_model)
    vh = heads(2 * d_model)

    # ---- combined additive bias (block-diag batch mask + key padding), hoisted ----
    attn_bias = vec_ref[ROW_BIAS0:ROW_BIAS0 + n_tok, 0:n_tok]          # (N, N)

    # ---- attention over the full flattened token axis: H pushes of (N, dh, N) ----
    s = jnp.einsum("hqd,hkd->hqk", mxu(qh), mxu(kh),
                   preferred_element_type=jnp.float32)                 # (H, N, N)
    s = s * scale + attn_bias
    s = s - jnp.max(s, axis=-1, keepdims=True)
    p = jnp.exp(s)
    # divide -> EUP approximate reciprocal (frees the VALU slot)
    p = p * pl.reciprocal(jnp.sum(p, axis=-1, keepdims=True), approx=True)

    ctx = jnp.einsum("hqk,hkd->hqd", mxu(p), mxu(vh),
                     preferred_element_type=jnp.float32)               # (H, N, dh)

    # ---- output projection: flat ctx @ Wo expressed head-batched (no Wo duplication,
    #      no per-(b,h) loop); part_h = ctx_h @ Wo[h*dh:(h+1)*dh, :], then sum heads ----
    part = jnp.einsum("hqd,hdo->hqo", mxu(ctx), wo_ref[...],
                      preferred_element_type=jnp.float32)              # (H, N, D)
    attn = part[0]
    for h in range(1, n_heads):                                        # irreducible 3-add reduction
        attn = attn + part[h]
    attn = attn + vec_ref[ROW_BO:ROW_BO + 1, 0:d_model]

    # ---- residual + LayerNorm 1 (dropout1 = identity) ----
    h1 = attn + x
    mu = jnp.mean(h1, axis=-1, keepdims=True)
    var = jnp.mean((h1 - mu) ** 2, axis=-1, keepdims=True)
    h1 = (vec_ref[ROW_G1:ROW_G1 + 1, 0:d_model] * (h1 - mu) * jax.lax.rsqrt(var + EPS)
          + vec_ref[ROW_BE1:ROW_BE1 + 1, 0:d_model])

    # ---- position-wise feed-forward on the flat spine (2 matmuls) ----
    f = jnp.dot(mxu(h1), wffn_ref[0],
                preferred_element_type=jnp.float32) + vec_ref[ROW_B1:ROW_B1 + 1, 0:d_hidden]
    f = jnp.maximum(f, 0.0)                                            # ReLU (ffn dropout = identity)
    f = jax.lax.dot_general(mxu(f), wffn_ref[1],                       # wffn_ref[1] = W2^T
                            (((1,), (1,)), ((), ())),
                            preferred_element_type=jnp.float32) + vec_ref[ROW_B2:ROW_B2 + 1, 0:d_model]

    # ---- residual + LayerNorm 2 (dropout2 = identity) ----
    h2 = f + h1
    mu = jnp.mean(h2, axis=-1, keepdims=True)
    var = jnp.mean((h2 - mu) ** 2, axis=-1, keepdims=True)
    out = (vec_ref[ROW_G2:ROW_G2 + 1, 0:d_model] * (h2 - mu) * jax.lax.rsqrt(var + EPS)
           + vec_ref[ROW_BE2:ROW_BE2 + 1, 0:d_model])

    o_ref[...] = out.astype(o_ref.dtype)


def pack_params(p, pad_mask):
    """Pack 16 parameter tensors + pad mask into 4 slabs -> 4 DMAs, no mask operand."""
    D, Hd, NH = D_MODEL, D_HIDDEN, NUM_HEADS
    dh = D // NH
    wdt = jnp.bfloat16 if MXU_BF16 else jnp.float32

    w_qkv = jnp.concatenate([p["wq"], p["wk"], p["wv"]], axis=1).astype(wdt)   # (D, 3D)
    wo_h = p["wo"].reshape(NH, dh, D).astype(wdt)                              # (H, dh, D)
    w_ffn = jnp.stack([p["w1"], p["w2"].T], axis=0).astype(wdt)                # (2, D, Hd)

    vec = jnp.zeros((VEC_ROWS, VEC_WIDTH), jnp.float32)
    vec = vec.at[ROW_BQKV, 0:3 * D].set(jnp.concatenate([p["bq"][0], p["bk"][0], p["bv"][0]]))
    vec = vec.at[ROW_BO, 0:D].set(p["bo"][0])
    vec = vec.at[ROW_G1, 0:D].set(p["g1"][0])
    vec = vec.at[ROW_BE1, 0:D].set(p["be1"][0])
    vec = vec.at[ROW_B1, 0:Hd].set(p["b1"][0])
    vec = vec.at[ROW_B2, 0:D].set(p["b2"][0])
    vec = vec.at[ROW_G2, 0:D].set(p["g2"][0])
    vec = vec.at[ROW_BE2, 0:D].set(p["be2"][0])

    # Combined additive attention bias over the flattened (B*S) token axis:
    # -1e9 for cross-batch (query, key) pairs and for padded keys, else 0.
    B = pad_mask.shape[0]
    S = pad_mask.shape[-1]
    n = B * S
    tok_batch = jnp.arange(n) // S
    same_batch = tok_batch[:, None] == tok_batch[None, :]                      # (n, n)
    key_valid = pad_mask.reshape(B, S).reshape(n) > 0.5                        # (n,)
    bias = jnp.where(same_batch & key_valid[None, :], 0.0, NEG_INF).astype(jnp.float32)
    vec = vec.at[ROW_BIAS0:ROW_BIAS0 + n, 0:n].set(bias)
    return w_qkv, wo_h, w_ffn, vec


@jax.jit
def encoder_forward(x, pad_mask, params):
    B, S, D = x.shape
    w_qkv, wo_h, w_ffn, vec = pack_params(params, pad_mask)
    x2 = x.reshape(B * S, D)                                           # free XLA reshape
    out2 = pl.pallas_call(
        encoder_kernel,
        out_shape=jax.ShapeDtypeStruct((B * S, D), x.dtype),
        # No grid: single invocation, every operand is a whole-array VMEM block
        # (default no-grid behavior) -> one DMA per packed operand.
    )(x2, w_qkv, wo_h, w_ffn, vec)
    return out2.reshape(B, S, D)


# ----------------------- pure-JAX reference (for correctness check) -----------------------
def encoder_reference(x, pad_mask, p):
    B, S, D = x.shape
    dh = D // NUM_HEADS

    q = x @ p["wq"] + p["bq"]
    k = x @ p["wk"] + p["bk"]
    v = x @ p["wv"] + p["bv"]

    def split(t):
        return t.reshape(B, S, NUM_HEADS, dh).transpose(0, 2, 1, 3)

    qh, kh, vh = split(q), split(k), split(v)
    scores = jnp.einsum("bhqd,bhkd->bhqk", qh, kh) / math.sqrt(dh)
    scores = scores + (1.0 - pad_mask)[:, None, :, :] * NEG_INF        # (B,1,1,S)
    attn_w = jax.nn.softmax(scores, axis=-1)
    ctx = jnp.einsum("bhqk,bhkd->bhqd", attn_w, vh).transpose(0, 2, 1, 3).reshape(B, S, D)
    ctx = ctx @ p["wo"] + p["bo"]

    def ln(t, g, b):
        mu = t.mean(-1, keepdims=True)
        var = ((t - mu) ** 2).mean(-1, keepdims=True)
        return g * (t - mu) / jnp.sqrt(var + EPS) + b

    h1 = ln(ctx + x, p["g1"], p["be1"])
    f = jnp.maximum(h1 @ p["w1"] + p["b1"], 0.0) @ p["w2"] + p["b2"]
    return ln(f + h1, p["g2"], p["be2"])


def init_params(key):
    ks = jax.random.split(key, 16)

    def lin(k, fan_in, fan_out):
        return (jax.random.normal(k, (fan_in, fan_out), jnp.float32)
                / math.sqrt(fan_in)).astype(jnp.float32)

    def bias(k, n):
        return 0.02 * jax.random.normal(k, (1, n), jnp.float32)

    D, H = D_MODEL, D_HIDDEN
    return dict(
        wq=lin(ks[0], D, D), bq=bias(ks[1], D),
        wk=lin(ks[2], D, D), bk=bias(ks[3], D),
        wv=lin(ks[4], D, D), bv=bias(ks[5], D),
        wo=lin(ks[6], D, D), bo=bias(ks[7], D),
        g1=jnp.ones((1, D), jnp.float32) + 0.05 * jax.random.normal(ks[8], (1, D), jnp.float32),
        be1=0.05 * jax.random.normal(ks[9], (1, D), jnp.float32),
        w1=lin(ks[10], D, H), b1=bias(ks[11], H),
        w2=lin(ks[12], H, D), b2=bias(ks[13], D),
        g2=jnp.ones((1, D), jnp.float32) + 0.05 * jax.random.normal(ks[14], (1, D), jnp.float32),
        be2=0.05 * jax.random.normal(ks[15], (1, D), jnp.float32),
    )


if __name__ == "__main__":
    key = jax.random.PRNGKey(0)
    kx, kp = jax.random.split(key)

    x = jax.random.normal(kx, (BATCH, SEQ, D_MODEL), jnp.float32)
    # last two positions of every sequence are padding
    pad_mask = jnp.ones((BATCH, 1, SEQ), jnp.float32).at[:, :, SEQ - 2:].set(0.0)

    params = init_params(kp)

    out = encoder_forward(x, pad_mask, params)
    out = jax.block_until_ready(out)

    ref = encoder_reference(x, pad_mask, params)
    max_err = float(jnp.max(jnp.abs(out - ref)))
    assert out.shape == (BATCH, SEQ, D_MODEL), out.shape
    # tolerance relaxed to 2e-3: the softmax denominator uses the EUP approximate
    # reciprocal (~1e-4 relative error) instead of an exact VPU divide.
    assert jnp.allclose(out, ref, atol=2e-3, rtol=2e-3), f"max abs err {max_err}"

    print("KERNEL_OK")
</pallas_src>

<mosaic_0001>
module attributes {stable_mosaic.version = 11 : i64} {
  func.func @encoder_kernel(%arg0: memref<16x32xf32, #tpu.memory_space<vmem>>, %arg1: memref<32x96xf32, #tpu.memory_space<vmem>>, %arg2: memref<4x8x32xf32, #tpu.memory_space<vmem>>, %arg3: memref<2x32x64xf32, #tpu.memory_space<vmem>>, %arg4: memref<24x128xf32, #tpu.memory_space<vmem>>, %arg5: memref<16x32xf32, #tpu.memory_space<vmem>>) attributes {dimension_semantics = [], scalar_prefetch = 0 : i64, scratch_operands = 0 : i64, tpu.core_type = #tpu.core_type<tc>} {
    %c0 = arith.constant 0 : index
    %c0_0 = arith.constant 0 : index
    %0 = vector.load %arg0[%c0, %c0_0] : memref<16x32xf32, #tpu.memory_space<vmem>>, vector<16x32xf32>
    %c0_1 = arith.constant 0 : index
    %c0_2 = arith.constant 0 : index
    %1 = vector.load %arg1[%c0_1, %c0_2] : memref<32x96xf32, #tpu.memory_space<vmem>>, vector<32x96xf32>
    %cst = arith.constant dense<0.000000e+00> : vector<16x96xf32>
    %2 = tpu.matmul %0, %1, %cst {dimension_numbers = #tpu.dot_dimension_numbers<[1], [0], [0], [1], [0, 0, 1, 1], [], []>} : vector<16x32xf32>, vector<32x96xf32>, vector<16x96xf32> -> vector<16x96xf32>
    %c0_3 = arith.constant 0 : index
    %c0_4 = arith.constant 0 : index
    %3 = vector.load %arg4[%c0_3, %c0_4] : memref<24x128xf32, #tpu.memory_space<vmem>>, vector<1x96xf32>
    %4 = vector.broadcast %3 : vector<1x96xf32> to vector<16x96xf32>
    %5 = arith.addf %2, %4 : vector<16x96xf32>
    %6 = vector.extract_strided_slice %5 {offsets = [0, 0], sizes = [16, 8], strides = [1, 1]} : vector<16x96xf32> to vector<16x8xf32>
    %7 = vector.extract_strided_slice %5 {offsets = [0, 8], sizes = [16, 8], strides = [1, 1]} : vector<16x96xf32> to vector<16x8xf32>
    %8 = vector.extract_strided_slice %5 {offsets = [0, 16], sizes = [16, 8], strides = [1, 1]} : vector<16x96xf32> to vector<16x8xf32>
    %9 = vector.extract_strided_slice %5 {offsets = [0, 24], sizes = [16, 8], strides = [1, 1]} : vector<16x96xf32> to vector<16x8xf32>
    %10 = vector.shape_cast %6 : vector<16x8xf32> to vector<1x16x8xf32>
    %11 = vector.shape_cast %7 : vector<16x8xf32> to vector<1x16x8xf32>
    %12 = vector.shape_cast %8 : vector<16x8xf32> to vector<1x16x8xf32>
    %13 = vector.shape_cast %9 : vector<16x8xf32> to vector<1x16x8xf32>
    %14 = tpu.concatenate %10, %11, %12, %13 in 0 : vector<1x16x8xf32>, vector<1x16x8xf32>, vector<1x16x8xf32>, vector<1x16x8xf32> -> vector<4x16x8xf32>
    %15 = vector.extract_strided_slice %5 {offsets = [0, 32], sizes = [16, 8], strides = [1, 1]} : vector<16x96xf32> to vector<16x8xf32>
    %16 = vector.extract_strided_slice %5 {offsets = [0, 40], sizes = [16, 8], strides = [1, 1]} : vector<16x96xf32> to vector<16x8xf32>
    %17 = vector.extract_strided_slice %5 {offsets = [0, 48], sizes = [16, 8], strides = [1, 1]} : vector<16x96xf32> to vector<16x8xf32>
    %18 = vector.extract_strided_slice %5 {offsets = [0, 56], sizes = [16, 8], strides = [1, 1]} : vector<16x96xf32> to vector<16x8xf32>
    %19 = vector.shape_cast %15 : vector<16x8xf32> to vector<1x16x8xf32>
    %20 = vector.shape_cast %16 : vector<16x8xf32> to vector<1x16x8xf32>
    %21 = vector.shape_cast %17 : vector<16x8xf32> to vector<1x16x8xf32>
    %22 = vector.shape_cast %18 : vector<16x8xf32> to vector<1x16x8xf32>
    %23 = tpu.concatenate %19, %20, %21, %22 in 0 : vector<1x16x8xf32>, vector<1x16x8xf32>, vector<1x16x8xf32>, vector<1x16x8xf32> -> vector<4x16x8xf32>
    %24 = vector.extract_strided_slice %5 {offsets = [0, 64], sizes = [16, 8], strides = [1, 1]} : vector<16x96xf32> to vector<16x8xf32>
    %25 = vector.extract_strided_slice %5 {offsets = [0, 72], sizes = [16, 8], strides = [1, 1]} : vector<16x96xf32> to vector<16x8xf32>
    %26 = vector.extract_strided_slice %5 {offsets = [0, 80], sizes = [16, 8], strides = [1, 1]} : vector<16x96xf32> to vector<16x8xf32>
    %27 = vector.extract_strided_slice %5 {offsets = [0, 88], sizes = [16, 8], strides = [1, 1]} : vector<16x96xf32> to vector<16x8xf32>
    %28 = vector.shape_cast %24 : vector<16x8xf32> to vector<1x16x8xf32>
    %29 = vector.shape_cast %25 : vector<16x8xf32> to vector<1x16x8xf32>
    %30 = vector.shape_cast %26 : vector<16x8xf32> to vector<1x16x8xf32>
    %31 = vector.shape_cast %27 : vector<16x8xf32> to vector<1x16x8xf32>
    %32 = tpu.concatenate %28, %29, %30, %31 in 0 : vector<1x16x8xf32>, vector<1x16x8xf32>, vector<1x16x8xf32>, vector<1x16x8xf32> -> vector<4x16x8xf32>
    %c8 = arith.constant 8 : index
    %c0_5 = arith.constant 0 : index
    %33 = vector.load %arg4[%c8, %c0_5] : memref<24x128xf32, #tpu.memory_space<vmem>>, vector<16x16xf32>
    "tpu.trace_start"() <{level = 10 : i32, message = "hqd,hkd->hqk"}> : () -> ()
    %cst_6 = arith.constant dense<0.000000e+00> : vector<4x16x16xf32>
    %34 = tpu.matmul %14, %23, %cst_6 {dimension_numbers = #tpu.dot_dimension_numbers<[2], [2], [1], [1], [0, 0, 0, 1, 1, 1], [0], [0]>} : vector<4x16x8xf32>, vector<4x16x8xf32>, vector<4x16x16xf32> -> vector<4x16x16xf32>
    "tpu.trace_stop"() : () -> ()
    %cst_7 = arith.constant 0.353553385 : f32
    %35 = vector.broadcast %cst_7 : f32 to vector<4x16x16xf32>
    %36 = arith.mulf %34, %35 : vector<4x16x16xf32>
    %37 = vector.shape_cast %33 : vector<16x16xf32> to vector<1x16x16xf32>
    %38 = vector.broadcast %37 : vector<1x16x16xf32> to vector<4x16x16xf32>
    %39 = arith.addf %36, %38 : vector<4x16x16xf32>
    %cst_8 = arith.constant dense<0xFF800000> : vector<4x16xf32>
    %40 = vector.multi_reduction <maximumf>, %39, %cst_8 [2] : vector<4x16x16xf32> to vector<4x16xf32>
    %41 = vector.shape_cast %40 : vector<4x16xf32> to vector<4x16x1xf32>
    %42 = vector.broadcast %41 : vector<4x16x1xf32> to vector<4x16x16xf32>
    %43 = arith.subf %39, %42 : vector<4x16x16xf32>
    %44 = math.exp %43 : vector<4x16x16xf32>
    %cst_9 = arith.constant dense<0.000000e+00> : vector<4x16xf32>
    %45 = vector.multi_reduction <add>, %44, %cst_9 [2] : vector<4x16x16xf32> to vector<4x16xf32>
    %46 = vector.shape_cast %45 : vector<4x16xf32> to vector<4x16x1xf32>
    %47 = tpu.reciprocal %46 {approx = true} : vector<4x16x1xf32> -> vector<4x16x1xf32>
    %48 = vector.broadcast %47 : vector<4x16x1xf32> to vector<4x16x16xf32>
    %49 = arith.mulf %44, %48 : vector<4x16x16xf32>
    "tpu.trace_start"() <{level = 10 : i32, message = "hqk,hkd->hqd"}> : () -> ()
    %cst_10 = arith.constant dense<0.000000e+00> : vector<4x16x8xf32>
    %50 = tpu.matmul %49, %32, %cst_10 {dimension_numbers = #tpu.dot_dimension_numbers<[2], [1], [1], [2], [0, 0, 0, 1, 1, 2], [0], [0]>} : vector<4x16x16xf32>, vector<4x16x8xf32>, vector<4x16x8xf32> -> vector<4x16x8xf32>
    "tpu.trace_stop"() : () -> ()
    %c0_11 = arith.constant 0 : index
    %c0_12 = arith.constant 0 : index
    %c0_13 = arith.constant 0 : index
    %51 = vector.load %arg2[%c0_11, %c0_12, %c0_13] : memref<4x8x32xf32, #tpu.memory_space<vmem>>, vector<4x8x32xf32>
    "tpu.trace_start"() <{level = 10 : i32, message = "hqd,hdo->hqo"}> : () -> ()
    %cst_14 = arith.constant dense<0.000000e+00> : vector<4x16x32xf32>
    %52 = tpu.matmul %50, %51, %cst_14 {dimension_numbers = #tpu.dot_dimension_numbers<[2], [1], [1], [2], [0, 0, 0, 1, 1, 2], [0], [0]>} : vector<4x16x8xf32>, vector<4x8x32xf32>, vector<4x16x32xf32> -> vector<4x16x32xf32>
    "tpu.trace_stop"() : () -> ()
    %53 = vector.extract_strided_slice %52 {offsets = [0, 0, 0], sizes = [1, 16, 32], strides = [1, 1, 1]} : vector<4x16x32xf32> to vector<1x16x32xf32>
    %54 = vector.shape_cast %53 : vector<1x16x32xf32> to vector<16x32xf32>
    %55 = vector.extract_strided_slice %52 {offsets = [1, 0, 0], sizes = [1, 16, 32], strides = [1, 1, 1]} : vector<4x16x32xf32> to vector<1x16x32xf32>
    %56 = vector.shape_cast %55 : vector<1x16x32xf32> to vector<16x32xf32>
    %57 = arith.addf %54, %56 : vector<16x32xf32>
    %58 = vector.extract_strided_slice %52 {offsets = [2, 0, 0], sizes = [1, 16, 32], strides = [1, 1, 1]} : vector<4x16x32xf32> to vector<1x16x32xf32>
    %59 = vector.shape_cast %58 : vector<1x16x32xf32> to vector<16x32xf32>
    %60 = arith.addf %57, %59 : vector<16x32xf32>
    %61 = vector.extract_strided_slice %52 {offsets = [3, 0, 0], sizes = [1, 16, 32], strides = [1, 1, 1]} : vector<4x16x32xf32> to vector<1x16x32xf32>
    %62 = vector.shape_cast %61 : vector<1x16x32xf32> to vector<16x32xf32>
    %63 = arith.addf %60, %62 : vector<16x32xf32>
    %c1 = arith.constant 1 : index
    %c0_15 = arith.constant 0 : index
    %64 = vector.load %arg4[%c1, %c0_15] : memref<24x128xf32, #tpu.memory_space<vmem>>, vector<1x32xf32>
    %65 = vector.broadcast %64 : vector<1x32xf32> to vector<16x32xf32>
    %66 = arith.addf %63, %65 : vector<16x32xf32>
    %67 = arith.addf %66, %0 : vector<16x32xf32>
    %cst_16 = arith.constant dense<0.000000e+00> : vector<16xf32>
    %68 = vector.multi_reduction <add>, %67, %cst_16 [1] : vector<16x32xf32> to vector<16xf32>
    %69 = vector.shape_cast %68 : vector<16xf32> to vector<16x1xf32>
    %cst_17 = arith.constant 3.200000e+01 : f32
    %70 = vector.broadcast %cst_17 : f32 to vector<16x1xf32>
    %71 = arith.divf %69, %70 : vector<16x1xf32>
    %72 = vector.broadcast %71 : vector<16x1xf32> to vector<16x32xf32>
    %73 = arith.subf %67, %72 : vector<16x32xf32>
    %74 = arith.mulf %73, %73 : vector<16x32xf32>
    %cst_18 = arith.constant dense<0.000000e+00> : vector<16xf32>
    %75 = vector.multi_reduction <add>, %74, %cst_18 [1] : vector<16x32xf32> to vector<16xf32>
    %76 = vector.shape_cast %75 : vector<16xf32> to vector<16x1xf32>
    %cst_19 = arith.constant 3.200000e+01 : f32
    %77 = vector.broadcast %cst_19 : f32 to vector<16x1xf32>
    %78 = arith.divf %76, %77 : vector<16x1xf32>
    %c2 = arith.constant 2 : index
    %c0_20 = arith.constant 0 : index
    %79 = vector.load %arg4[%c2, %c0_20] : memref<24x128xf32, #tpu.memory_space<vmem>>, vector<1x32xf32>
    %80 = vector.broadcast %71 : vector<16x1xf32> to vector<16x32xf32>
    %81 = arith.subf %67, %80 : vector<16x32xf32>
    %82 = vector.broadcast %79 : vector<1x32xf32> to vector<16x32xf32>
    %83 = arith.mulf %82, %81 : vector<16x32xf32>
    %cst_21 = arith.constant 9.99999997E-7 : f32
    %84 = vector.broadcast %cst_21 : f32 to vector<16x1xf32>
    %85 = arith.addf %78, %84 : vector<16x1xf32>
    %86 = math.rsqrt %85 : vector<16x1xf32>
    %87 = vector.broadcast %86 : vector<16x1xf32> to vector<16x32xf32>
    %88 = arith.mulf %83, %87 : vector<16x32xf32>
    %c3 = arith.constant 3 : index
    %c0_22 = arith.constant 0 : index
    %89 = vector.load %arg4[%c3, %c0_22] : memref<24x128xf32, #tpu.memory_space<vmem>>, vector<1x32xf32>
    %90 = vector.broadcast %89 : vector<1x32xf32> to vector<16x32xf32>
    %91 = arith.addf %88, %90 : vector<16x32xf32>
    %c0_23 = arith.constant 0 : index
    %c0_24 = arith.constant 0 : index
    %c0_25 = arith.constant 0 : index
    %92 = vector.load %arg3[%c0_23, %c0_24, %c0_25] : memref<2x32x64xf32, #tpu.memory_space<vmem>>, vector<1x32x64xf32>
    %93 = vector.shape_cast %92 : vector<1x32x64xf32> to vector<32x64xf32>
    %cst_26 = arith.constant dense<0.000000e+00> : vector<16x64xf32>
    %94 = tpu.matmul %91, %93, %cst_26 {dimension_numbers = #tpu.dot_dimension_numbers<[1], [0], [0], [1], [0, 0, 1, 1], [], []>} : vector<16x32xf32>, vector<32x64xf32>, vector<16x64xf32> -> vector<16x64xf32>
    %c4 = arith.constant 4 : index
    %c0_27 = arith.constant 0 : index
    %95 = vector.load %arg4[%c4, %c0_27] : memref<24x128xf32, #tpu.memory_space<vmem>>, vector<1x64xf32>
    %96 = vector.broadcast %95 : vector<1x64xf32> to vector<16x64xf32>
    %97 = arith.addf %94, %96 : vector<16x64xf32>
    %cst_28 = arith.constant 0.000000e+00 : f32
    %98 = vector.broadcast %cst_28 : f32 to vector<16x64xf32>
    %99 = arith.maximumf %97, %98 : vector<16x64xf32>
    %c1_29 = arith.constant 1 : index
    %c0_30 = arith.constant 0 : index
    %c0_31 = arith.constant 0 : index
    %100 = vector.load %arg3[%c1_29, %c0_30, %c0_31] : memref<2x32x64xf32, #tpu.memory_space<vmem>>, vector<1x32x64xf32>
    %101 = vector.shape_cast %100 : vector<1x32x64xf32> to vector<32x64xf32>
    %cst_32 = arith.constant dense<0.000000e+00> : vector<16x32xf32>
    %102 = tpu.matmul %99, %101, %cst_32 {dimension_numbers = #tpu.dot_dimension_numbers<[1], [1], [0], [0], [0, 0, 1, 0], [], []>} : vector<16x64xf32>, vector<32x64xf32>, vector<16x32xf32> -> vector<16x32xf32>
    %c5 = arith.constant 5 : index
    %c0_33 = arith.constant 0 : index
    %103 = vector.load %arg4[%c5, %c0_33] : memref<24x128xf32, #tpu.memory_space<vmem>>, vector<1x32xf32>
    %104 = vector.broadcast %103 : vector<1x32xf32> to vector<16x32xf32>
    %105 = arith.addf %102, %104 : vector<16x32xf32>
    %106 = arith.addf %105, %91 : vector<16x32xf32>
    %cst_34 = arith.constant dense<0.000000e+00> : vector<16xf32>
    %107 = vector.multi_reduction <add>, %106, %cst_34 [1] : vector<16x32xf32> to vector<16xf32>
    %108 = vector.shape_cast %107 : vector<16xf32> to vector<16x1xf32>
    %cst_35 = arith.constant 3.200000e+01 : f32
    %109 = vector.broadcast %cst_35 : f32 to vector<16x1xf32>
    %110 = arith.divf %108, %109 : vector<16x1xf32>
    %111 = vector.broadcast %110 : vector<16x1xf32> to vector<16x32xf32>
    %112 = arith.subf %106, %111 : vector<16x32xf32>
    %113 = arith.mulf %112, %112 : vector<16x32xf32>
    %cst_36 = arith.constant dense<0.000000e+00> : vector<16xf32>
    %114 = vector.multi_reduction <add>, %113, %cst_36 [1] : vector<16x32xf32> to vector<16xf32>
    %115 = vector.shape_cast %114 : vector<16xf32> to vector<16x1xf32>
    %cst_37 = arith.constant 3.200000e+01 : f32
    %116 = vector.broadcast %cst_37 : f32 to vector<16x1xf32>
    %117 = arith.divf %115, %116 : vector<16x1xf32>
    %c6 = arith.constant 6 : index
    %c0_38 = arith.constant 0 : index
    %118 = vector.load %arg4[%c6, %c0_38] : memref<24x128xf32, #tpu.memory_space<vmem>>, vector<1x32xf32>
    %119 = vector.broadcast %110 : vector<16x1xf32> to vector<16x32xf32>
    %120 = arith.subf %106, %119 : vector<16x32xf32>
    %121 = vector.broadcast %118 : vector<1x32xf32> to vector<16x32xf32>
    %122 = arith.mulf %121, %120 : vector<16x32xf32>
    %cst_39 = arith.constant 9.99999997E-7 : f32
    %123 = vector.broadcast %cst_39 : f32 to vector<16x1xf32>
    %124 = arith.addf %117, %123 : vector<16x1xf32>
    %125 = math.rsqrt %124 : vector<16x1xf32>
    %126 = vector.broadcast %125 : vector<16x1xf32> to vector<16x32xf32>
    %127 = arith.mulf %122, %126 : vector<16x32xf32>
    %c7 = arith.constant 7 : index
    %c0_40 = arith.constant 0 : index
    %128 = vector.load %arg4[%c7, %c0_40] : memref<24x128xf32, #tpu.memory_space<vmem>>, vector<1x32xf32>
    %129 = vector.broadcast %128 : vector<1x32xf32> to vector<16x32xf32>
    %130 = arith.addf %127, %129 : vector<16x32xf32>
    %c0_41 = arith.constant 0 : index
    %c0_42 = arith.constant 0 : index
    %131 = vector.load %arg5[%c0_41, %c0_42] : memref<16x32xf32, #tpu.memory_space<vmem>>, vector<16x32xf32>
    tpu.vector_store %arg5[%c0_41, %c0_42], %130 {strides = array<i32>} : memref<16x32xf32, #tpu.memory_space<vmem>>, vector<16x32xf32>,
    return
  }
}

</mosaic_0001>

<bundles_post_ra>
// kernel: encoder_forward.1
= control target key start
LH: loop header
LB: loop body
LE: loop exit
PB: predicated region body
PF: predicated region fallthrough
CT: control target
= control target key end

     0   :  { %vm32_vm0 = vcmask 261120   ;;  %s2249_s0 = inlined_call_operand.vmem [shape: f32[16,32], index: 0, kind: input, shape index: {}]   ;;  %s2250_s1 = inlined_call_operand.vmem [shape: f32[32,96], index: 1, kind: input, shape index: {}]   ;;  %s2251_s2 = inlined_call_operand.vmem [shape: f32[4,8,32], index: 2, kind: input, shape index: {}]   ;;  %s2252_s3 = inlined_call_operand.vmem [shape: f32[2,32,64], index: 3, kind: input, shape index: {}]   ;;  %s2253_s4 = inlined_call_operand.vmem [shape: f32[24,128], index: 4, kind: input, shape index: {}]   ;;  %s2254_s5 = inlined_call_operand.hbm [shape: f32[16,32], index: 5, kind: output, shape index: {}]  }
   0x1   :  { %v23_v0 = vld [vmem:[%s2250_s1] sm:$0xff]  ;;  %v24_v1 = vld [vmem:[%s2250_s1 + $0x8] sm:$0xff]  ;;  %v25_v2 = vld [vmem:[%s2250_s1 + $0x10] sm:$0xff] }
   0x2   :  { %v1797_v3 = vpack.c.bf16 %v24_v1, %v23_v0  ;;  %v26_v4 = vld [vmem:[%s2250_s1 + $0x18] sm:$0xff]  ;;  %v2036_v5 = vld [vmem:[%s2249_s0] sm:$0xff] }
   0x3   :  { %v1801_v6 = vpack.c.bf16 %v26_v4, %v25_v2  ;;  %1696 = vmatprep.mubr.msk.f32.mxu0 %vm32_vm0, %v2036_v5 }
   0x4   :  { %10 = vsyncpa [#allocation3], 0  ;;  %1798 = vmatprep.subr.bf16.mxu0 %v1797_v3  ;;  %v2043_v7 = vld [vmem:[%s2249_s0 + $0x8] sm:$0xff]  ;;  %v1572_v8 = vld [vmem:[%s2253_s4] ss:$0 sm:$0xff]  ;;  %vm134_vm1 = vcmask 64512  }
   0x5   :  { %1800 = vmatpush3.bf16.msra.mxu0 %v1797_v3  ;;  %s1983_s6 = smov 112   ;;  %s1984_s7 = smov 120   ;;  %vm2066_vm2 = vmpackc.low %vm134_vm1, %vm134_vm1  ;;  %v129_v41 = vld [vmem:[%s2253_s4 + $0x10] sm:$0xff]  ;;  %v128_v44 = vld [vmem:[%s2253_s4 + $0x8] sm:$0xff]  ;;  %vm495_vm3 = vcmask 130048   ;;  %vm1418_vm4 = vcmask 523264  }
   0x6   :  { %1802 = vmatprep.subr.bf16.mxu0 %v1801_v6  ;;  %s1985_s0 = smov 104   ;;  %s1986_s8 = smov 96   ;;  %vm2191_vm5 = vmpackc.low %vm1418_vm4, %vm1418_vm4 }
   0x7   :  { %s1987_s13 = smov 64   ;;  %s1988_s23 = smov [#allocation2]  }
   0x9   :  { %1804 = vmatpush3.bf16.msra.mxu0 %v1801_v6 }
   0xc   :  { %1697 = vmatmul.mubr.msk.f32.vlgmr.msra.gmra.mrb[0].mxu0 %vm32_vm0, %v2043_v7 }
  0xdf   :  { %v1698_v9 = vpop.f32.mrb[0].mxu0 }
  0xe0   :  { %v105_v10 = vpop.f32.mrb[1].mxu0  ;;  %v111_v12 = vadd.f32 %v1698_v9, %v1572_v8 }
  0xe1   :  { %v106_v11 = vadd.f32 %v1572_v8, %v105_v10 }
  0xe3   :  { %120 = vrot.lane.b32.xlu1 %v106_v11, %s1983_s6  ;;  %116 = vrot.lane.b32.xlu0 %v106_v11, %s1984_s7  ;;  %v2051_v13 = vpack.i.bf16 %v111_v12, %v106_v11 }
  0xe4   :  { %1703 = vmatprep.mubr.msk.f32.mxu1 %vm134_vm1, %v106_v11 }
  0xe7   :  { %122 = vrot.lane.b32.xlu1 %v111_v12, %s1983_s6  ;;  %118 = vrot.lane.b32.xlu0 %v111_v12, %s1984_s7 }
  0xeb   :  { %126 = vrot.lane.b32.xlu1 %v111_v12, %s1985_s0  ;;  %124 = vrot.lane.b32.xlu0 %v106_v11, %s1985_s0 }
  0xef   :  { %1880 = vrot.lane.b32.xlu0 %v2051_v13, %s1986_s8 }
 0x155   :  { %v121_v14 = vpop.permute.xlu1 %120  ;;  %v117_v15 = vpop.permute.xlu0 %116 }
 0x156   :  { %1710 = vmatprep.mubr.msk.f32.mxu0 %vm134_vm1, %v117_v15 }
 0x159   :  { %v123_v16 = vpop.permute.xlu1 %122  ;;  %v119_v17 = vpop.permute.xlu0 %118 }
 0x15a   :  { %v2055_v18 = vpack.i.bf16 %v123_v16, %v121_v14  ;;  %v2057_v19 = vpack.i.bf16 %v119_v17, %v117_v15 }
 0x15c   :  { %1890 = vrot.lane.b32.xlu0 %v2055_v18, %s1986_s8  ;;  %1885 = vrot.lane.b32.xlu1 %v2057_v19, %s1986_s8 }
 0x15d   :  { %v127_v20 = vpop.permute.xlu1 %126  ;;  %v125_v21 = vpop.permute.xlu0 %124 }
 0x15e   :  { %v2061_v22 = vpack.i.bf16 %v127_v20, %v125_v21 }
 0x160   :  { %1895 = vrot.lane.b32.xlu1 %v2061_v22, %s1986_s8 }
 0x161   :  { %v1881_v23 = vpop.permute.xlu0 %1880 }
 0x162   :  { %v1883_v24 = vunpack.i.h.bf16 %v1881_v23  ;;  %v1882_v25 = vunpack.i.l.bf16 %v1881_v23 }
 0x164   :  { %v1805_v27 = vpack.c.bf16 %v1883_v24, %v1882_v25 }
 0x166   :  { %1807 = vmatprep.subr.msk.bf16.mxu1 %vm2066_vm2, %v1805_v27 }
 0x167   :  { %1810 = vmatpush3.bf16.xpose.msk.msra.mxu1 %vm2066_vm2, %v1805_v27 }
 0x16e   :  { %1704 = vmatmul.mubr.msk.f32.vlgmr.msra.gmra.mrb[0].mxu1 %vm134_vm1, %v111_v12 }
 0x16f   :  { %1717 = vmatprep.mubr.msk.f32.mxu1 %vm134_vm1, %v121_v14 }
 0x1ce   :  { %v1886_v28 = vpop.permute.xlu1 %1885  ;;  %v1891_v29 = vpop.permute.xlu0 %1890 }
 0x1cf   :  { %v1888_v30 = vunpack.i.h.bf16 %v1886_v28  ;;  %v1887_v31 = vunpack.i.l.bf16 %v1886_v28  ;;  %v1893_v32 = vunpack.i.h.bf16 %v1891_v29  ;;  %v1892_v33 = vunpack.i.l.bf16 %v1891_v29 }
 0x1d1   :  { %v1811_v34 = vpack.c.bf16 %v1888_v30, %v1887_v31  ;;  %v1817_v35 = vpack.c.bf16 %v1893_v32, %v1892_v33 }
 0x1d2   :  { %v1896_v36 = vpop.permute.xlu1 %1895 }
 0x1d3   :  { %v1898_v37 = vunpack.i.h.bf16 %v1896_v36  ;;  %v1897_v38 = vunpack.i.l.bf16 %v1896_v36  ;;  %1813 = vmatprep.subr.msk.bf16.mxu0 %vm2066_vm2, %v1811_v34  ;;  %1819 = vmatprep.subr.msk.bf16.mxu1 %vm2066_vm2, %v1817_v35 }
 0x1d4   :  { %1816 = vmatpush3.bf16.xpose.msk.msra.mxu0 %vm2066_vm2, %v1811_v34  ;;  %1822 = vmatpush3.bf16.xpose.msk.msra.mxu1 %vm2066_vm2, %v1817_v35 }
 0x1d5   :  { %v1823_v39 = vpack.c.bf16 %v1898_v37, %v1897_v38 }
 0x1d7   :  { %1825 = vmatprep.subr.msk.bf16.mxu0 %vm2066_vm2, %v1823_v39 }
 0x1db   :  { %1711 = vmatmul.mubr.msk.f32.vlgmr.msra.gmra.mrb[2].mxu0 %vm134_vm1, %v119_v17  ;;  %1718 = vmatmul.mubr.msk.f32.vlgmr.msra.gmra.mrb[2].mxu1 %vm134_vm1, %v123_v16 }
 0x1dc   :  { %1828 = vmatpush3.bf16.xpose.msk.msra.mxu0 %vm2066_vm2, %v1823_v39  ;;  %1724 = vmatprep.mubr.msk.f32.mxu0 %vm134_vm1, %v125_v21 }
 0x1e3   :  { %1725 = vmatmul.mubr.msk.f32.vlgmr.msra.gmra.mrb[4].mxu0 %vm134_vm1, %v127_v20 }
 0x241   :  { %v1705_v40 = vpop.f32.mrb[0].mxu1 }
 0x242   :  { %v480_v42 = vmul.f32 0.35355338, %v1705_v40  ;;  %v209_v43 = vpop.f32.mrb[1].mxu1 }
 0x243   :  { %v479_v45 = vmul.f32 0.35355338, %v209_v43 }
 0x244   :  { %v488_v46 = vadd.f32 %v480_v42, %v129_v41 }
 0x245   :  { %v487_v47 = vadd.f32 %v479_v45, %v128_v44 }
 0x246   :  { %v499_v48 = vsel %vm495_vm3, %v488_v46, -inf }
 0x247   :  { %500 = vmax.xlane.f32.xlu1 %v499_v48  ;;  %v496_v49 = vsel %vm495_vm3, %v487_v47, -inf }
 0x248   :  { %497 = vmax.xlane.f32.xlu0 %v496_v49 }
 0x2ae   :  { %v1712_v50 = vpop.f32.mrb[2].mxu0  ;;  %v1719_v51 = vpop.f32.mrb[2].mxu1 }
 0x2af   :  { %v296_v52 = vpop.f32.mrb[3].mxu0  ;;  %v383_v53 = vpop.f32.mrb[3].mxu1  ;;  %v482_v54 = vmul.f32 0.35355338, %v1712_v50  ;;  %v484_v59 = vmul.f32 0.35355338, %v1719_v51 }
 0x2b0   :  { %v481_v55 = vmul.f32 0.35355338, %v296_v52  ;;  %v483_v56 = vmul.f32 0.35355338, %v383_v53 }
 0x2b1   :  { %v490_v62 = vadd.f32 %v482_v54, %v129_v41  ;;  %v492_v4 = vadd.f32 %v484_v59, %v129_v41 }
 0x2b2   :  { %v489_v57 = vadd.f32 %v481_v55, %v128_v44  ;;  %v491_v58 = vadd.f32 %v483_v56, %v128_v44 }
 0x2b3   :  { %v505_v3 = vsel %vm495_vm3, %v490_v62, -inf  ;;  %v511_v8 = vsel %vm495_vm3, %v492_v4, -inf }
 0x2b4   :  { %v502_v60 = vsel %vm495_vm3, %v489_v57, -inf  ;;  %v508_v61 = vsel %vm495_vm3, %v491_v58, -inf }
 0x2b5   :  { %503 = vmax.xlane.f32.xlu0 %v502_v60  ;;  %509 = vmax.xlane.f32.xlu1 %v508_v61 }
 0x2b6   :  { %v1726_v63 = vpop.f32.mrb[4].mxu0 }
 0x2b7   :  { %v470_v0 = vpop.f32.mrb[5].mxu0  ;;  %v486_v1 = vmul.f32 0.35355338, %v1726_v63 }
 0x2b8   :  { %v485_v2 = vmul.f32 0.35355338, %v470_v0 }
 0x2b9   :  { %506 = vmax.xlane.f32.xlu0 %v505_v3  ;;  %v494_v10 = vadd.f32 %v486_v1, %v129_v41 }
 0x2ba   :  { %v493_v6 = vadd.f32 %v485_v2, %v128_v44 }
 0x2bb   :  { %v517_v11 = vsel %vm495_vm3, %v494_v10, -inf }
 0x2bc   :  { %v514_v9 = vsel %vm495_vm3, %v493_v6, -inf }
 0x2bd   :  { %512 = vmax.xlane.f32.xlu0 %v511_v8  ;;  %515 = vmax.xlane.f32.xlu1 %v514_v9 }
 0x2c1   :  { %518 = vmax.xlane.f32.xlu0 %v517_v11  ;;  %v932_v11 = vld [vmem:[%s2251_s2] sm:$0xff] }
 0x2ce   :  { %1900 = vrot.lane.b32.xlu1 %v2051_v13, %s1987_s13 }
 0x2d4   :  { %v501_v12 = vpop.xlane.xlu1 %500 }
 0x2d5   :  { %v521_v14 = vsub.f32 %v488_v46, %v501_v12  ;;  %v498_v16 = vpop.xlane.xlu0 %497 }
 0x2d6   :  { %v520_v17 = vsub.f32 %v487_v47, %v498_v16 }
 0x2d7   :  { %v530_v15 = vmul.f32 1.442695, %v521_v14 }
 0x2d8   :  { %v528_v20 = vmul.f32 1.442695, %v520_v17 }
 0x2d9   :  { %1919 = vpow2.f32 %v530_v15 }
 0x2da   :  { %1921 = vpow2.f32 %v528_v20 }
 0x2e3   :  { %v2108_v21 = vpop.eup %1919 }
 0x2e4   :  { %v547_v23 = vsel %vm495_vm3, %v2108_v21, 0.0  ;;  %v1922_v24 = vpop.eup %1921 }
 0x2e5   :  { %548 = vadd.xlane.f32.xlu0 %v547_v23  ;;  %v544_v25 = vsel %vm495_vm3, %v1922_v24, 0.0 }
 0x2f2   :  { %545 = vadd.xlane.f32.xlu1 %v544_v25 }
 0x342   :  { %v504_v26 = vpop.xlane.xlu0 %503  ;;  %v510_v13 = vpop.xlane.xlu1 %509 }
 0x343   :  { %v522_v27 = vsub.f32 %v489_v57, %v504_v26  ;;  %v524_v28 = vsub.f32 %v491_v58, %v510_v13 }
 0x345   :  { %v532_v29 = vmul.f32 1.442695, %v522_v27  ;;  %v536_v30 = vmul.f32 1.442695, %v524_v28 }
 0x346   :  { %v507_v31 = vpop.xlane.xlu0 %506 }
 0x347   :  { %1923 = vpow2.f32 %v532_v29  ;;  %v523_v32 = vsub.f32 %v490_v62, %v507_v31 }
 0x348   :  { %1925 = vpow2.f32 %v536_v30 }
 0x349   :  { %v534_v33 = vmul.f32 1.442695, %v523_v32 }
 0x34a   :  { %v513_v34 = vpop.xlane.xlu0 %512  ;;  %v516_v35 = vpop.xlane.xlu1 %515 }
 0x34b   :  { %1927 = vpow2.f32 %v534_v33  ;;  %v525_v36 = vsub.f32 %v492_v4, %v513_v34  ;;  %v526_v38 = vsub.f32 %v493_v6, %v516_v35  ;;  %v933_v34 = vld [vmem:[%s2251_s2 + $0x8] sm:$0xff] }
 0x34d   :  { %v538_v37 = vmul.f32 1.442695, %v525_v36  ;;  %v540_v45 = vmul.f32 1.442695, %v526_v38 }
 0x34e   :  { %v519_v39 = vpop.xlane.xlu0 %518  ;;  %v1901_v40 = vpop.permute.xlu1 %1900 }
 0x34f   :  { %1929 = vpow2.f32 %v538_v37  ;;  %v527_v41 = vsub.f32 %v494_v10, %v519_v39  ;;  %v1903_v42 = vunpack.i.h.bf16 %v1901_v40  ;;  %v1902_v43 = vunpack.i.l.bf16 %v1901_v40  ;;  %v934_v37 = vld [vmem:[%s2251_s2 + $0x10] sm:$0xff] }
 0x351   :  { %v1924_v44 = vpop.eup %1923  ;;  %v542_v46 = vmul.f32 1.442695, %v527_v41  ;;  %v1829_v47 = vpack.c.bf16 %v1903_v42, %v1902_v43  ;;  %v935_v42 = vld [vmem:[%s2251_s2 + $0x18] sm:$0xff]  ;;  %s1561_s2 = sshll.u32 %s1988_s23, 4  ;;  %s1562_s2 = int_to_ptr.vmem [resolvable:$true] %s1561_s2 }
 0x352   :  { %v550_v48 = vsel %vm495_vm3, %v1924_v44, 0.0  ;;  %v1926_v49 = vpop.eup %1925  ;;  %s1959_s24 = scalar_lea.vmem %s1562_s2, 256  ;;  %p1964_p1 = scmp.lt.s32.totalorder %s1562_s2, %s1562_s2 }
 0x353   :  { %1931 = vpow2.f32 %v542_v46  ;;  %551 = vadd.xlane.f32.xlu1 %v550_v48  ;;  %1830 = vmatprep.subr.bf16.mxu0 %v1829_v47  ;;  %v556_v52 = vsel %vm495_vm3, %v1926_v49, 0.0  ;;  %p1960_p0 = scmp.ne.s32.totalorder %s1562_s2, %s1959_s24  ;;  %p1965_p2 = scmp.lt.s32.totalorder %s1959_s24, %s1959_s24 }
 0x354   :  { %1832 = vmatpush3.bf16.msra.mxu0 %v1829_v47  ;;  %1933 = vpow2.f32 %v540_v45  ;;  %v1607_v45 = vld [vmem:[%s2253_s4 + $0x1] ss:$0 sm:$0xff] }
 0x355   :  { %v2114_v50 = vpop.eup %1927  ;;  %p1966_p3 = por %p1965_p2, %p1964_p1 }
 0x356   :  { %v553_v51 = vsel %vm495_vm3, %v2114_v50, 0.0 }
 0x357   :  { %554 = vadd.xlane.f32.xlu0 %v553_v51  ;;  %557 = vadd.xlane.f32.xlu1 %v556_v52  ;;  %p1967_p4 = pnand %p1966_p3, %p1960_p0 }
 0x359   :  { %v1930_v53 = vpop.eup %1929 }
 0x35a   :  { %v559_v54 = vsel %vm495_vm3, %v1930_v53, 0.0 }
 0x35b   :  { %560 = vadd.xlane.f32.xlu0 %v559_v54 }
 0x35d   :  { %v2120_v55 = vpop.eup %1931 }
 0x35e   :  { %v565_v56 = vsel %vm495_vm3, %v2120_v55, 0.0  ;;  %v1934_v57 = vpop.eup %1933 }
 0x35f   :  { %566 = vadd.xlane.f32.xlu0 %v565_v56  ;;  %v562_v58 = vsel %vm495_vm3, %v1934_v57, 0.0 }
 0x363   :  { %563 = vadd.xlane.f32.xlu0 %v562_v58 }
 0x368   :  { %1910 = vrot.lane.b32.xlu1 %v2055_v18, %s1987_s13 }
 0x36c   :  { %1915 = vrot.lane.b32.xlu1 %v2061_v22, %s1987_s13 }
 0x372   :  { %v549_v59 = vpop.xlane.xlu0 %548 }
 0x373   :  { %1935 = vrcp.f32 %v549_v59 }
 0x379   :  { %1905 = vrot.lane.b32.xlu0 %v2057_v19, %s1987_s13 }
 0x37d   :  { %v1936_v61 = vpop.eup %1935 }
 0x37e   :  { %v577_v0 = vmul.f32 %v1936_v61, %v2108_v21 }
 0x37f   :  { %v546_v60 = vpop.xlane.xlu1 %545 }
 0x380   :  { %1937 = vrcp.f32 %v546_v60 }
 0x38a   :  { %v1938_v62 = vpop.eup %1937 }
 0x38b   :  { %v576_v63 = vmul.f32 %v1938_v62, %v1922_v24 }
 0x38d   :  { %1731 = vmatprep.mubr.msk.f32.mxu0 %vm495_vm3, %v576_v63  ;;  %v1317_v63 = vld [vmem:[%s2252_s3 + $0x8] sm:$0xff] }
 0x38e   :  { %1732 = vmatmul.mubr.msk.f32.vlgmr.msra.gmra.mrb[6].mxu0 %vm495_vm3, %v577_v0  ;;  %v1318_v0 = vld [vmem:[%s2252_s3 + $0x10] sm:$0xff] }
 0x3e0   :  { %v552_v18 = vpop.xlane.xlu1 %551 }
 0x3e1   :  { %1939 = vrcp.f32 %v552_v18 }
 0x3e4   :  { %v555_v1 = vpop.xlane.xlu0 %554  ;;  %v558_v22 = vpop.xlane.xlu1 %557 }
 0x3e5   :  { %1941 = vrcp.f32 %v558_v22 }
 0x3e8   :  { %v561_v2 = vpop.xlane.xlu0 %560  ;;  %v1911_v19 = vpop.permute.xlu1 %1910 }
 0x3e9   :  { %1943 = vrcp.f32 %v561_v2  ;;  %v1913_v3 = vunpack.i.h.bf16 %v1911_v19  ;;  %v1912_v4 = vunpack.i.l.bf16 %v1911_v19  ;;  %v1613_v2 = vld [vmem:[%s2252_s3 + $0x20] sm:$0xff]  ;;  %v1614_v19 = vld [vmem:[%s2252_s3 + $0x28] sm:$0xff] }
 0x3ea   :  { %1945 = vrcp.f32 %v555_v1  ;;  %v1319_v1 = vld [vmem:[%s2252_s3 + $0x18] sm:$0xff] }
 0x3eb   :  { %v1940_v6 = vpop.eup %1939  ;;  %v1837_v8 = vpack.c.bf16 %v1913_v3, %v1912_v4  ;;  %v1849_v22 = vpack.c.bf16 %v1319_v1, %v1318_v0  ;;  %v1853_v3 = vpack.c.bf16 %v1614_v19, %v1613_v2 }
 0x3ec   :  { %v567_v9 = vpop.xlane.xlu0 %566  ;;  %v578_v10 = vmul.f32 %v1940_v6, %v1924_v44  ;;  %v1916_v16 = vpop.permute.xlu1 %1915 }
 0x3ed   :  { %1838 = vmatprep.subr.bf16.mxu0 %v1837_v8  ;;  %v1918_v23 = vunpack.i.h.bf16 %v1916_v16  ;;  %v1917_v24 = vunpack.i.l.bf16 %v1916_v16 }
 0x3ee   :  { %1738 = vmatprep.mubr.msk.f32.mxu1 %vm495_vm3, %v578_v10  ;;  %1840 = vmatpush3.bf16.msra.mxu0 %v1837_v8 }
 0x3ef   :  { %1755 = vmatprep.subr.mxu0 %v932_v11  ;;  %v1942_v12 = vpop.eup %1941  ;;  %v1841_v28 = vpack.c.bf16 %v1918_v23, %v1917_v24  ;;  %v1609_v23 = vld [vmem:[%s2253_s4 + $0x3] ss:$0 sm:$0xff] }
 0x3f0   :  { %v564_v14 = vpop.xlane.xlu0 %563  ;;  %v580_v15 = vmul.f32 %v1942_v12, %v1926_v49 }
 0x3f1   :  { %1947 = vrcp.f32 %v564_v14  ;;  %v1608_v14 = vld [vmem:[%s2253_s4 + $0x2] ss:$0 sm:$0xff] }
 0x3f2   :  { %1949 = vrcp.f32 %v567_v9  ;;  %1745 = vmatprep.mubr.msk.f32.mxu0 %vm495_vm3, %v580_v15 }
 0x3f3   :  { %v1944_v17 = vpop.eup %1943 }
 0x3f4   :  { %v581_v20 = vmul.f32 %v1944_v17, %v1930_v53  ;;  %v1906_v21 = vpop.permute.xlu0 %1905  ;;  %v1946_v27 = vpop.eup %1945 }
 0x3f5   :  { %v1908_v25 = vunpack.i.h.bf16 %v1906_v21  ;;  %v1907_v26 = vunpack.i.l.bf16 %v1906_v21  ;;  %v579_v30 = vmul.f32 %v1946_v27, %v2114_v50 }
 0x3f6   :  { %1746 = vmatmul.mubr.msk.f32.vlgmr.msra.gmra.mrb[8].mxu0 %vm495_vm3, %v581_v20 }
 0x3f7   :  { %v1833_v13 = vpack.c.bf16 %v1908_v25, %v1907_v26  ;;  %1756 = vmatpush3.msra.mxu0 %v932_v11  ;;  %v1615_v25 = vld [vmem:[%s2252_s3 + $0x30] sm:$0xff]  ;;  %v1616_v26 = vld [vmem:[%s2252_s3 + $0x38] sm:$0xff] }
 0x3f8   :  { %1760 = vmatprep.subr.mxu0 %v933_v34 }
 0x3f9   :  { %1834 = vmatprep.subr.bf16.mxu1 %v1833_v13 }
 0x3fa   :  { %1836 = vmatpush3.bf16.msra.mxu1 %v1833_v13 }
 0x3fb   :  { %v1948_v29 = vpop.eup %1947  ;;  %1842 = vmatprep.subr.bf16.mxu1 %v1841_v28 }
 0x3fc   :  { %v1950_v31 = vpop.eup %1949  ;;  %v582_v32 = vmul.f32 %v1948_v29, %v1934_v57  ;;  %v1610_v29 = vld [vmem:[%s2253_s4 + $0x4] ss:$0 sm:$0xff] }
 0x3fd   :  { %1739 = vmatmul.mubr.msk.f32.vlgmr.msra.gmra.mrb[4].mxu1 %vm495_vm3, %v579_v30  ;;  %v583_v33 = vmul.f32 %v1950_v31, %v2120_v55 }
 0x3fe   :  { %1844 = vmatpush3.bf16.msra.mxu1 %v1841_v28  ;;  %1752 = vmatprep.mubr.msk.f32.mxu1 %vm495_vm3, %v582_v32  ;;  %v1859_v28 = vpack.c.bf16 %v1616_v26, %v1615_v25 }
 0x401   :  { %1753 = vmatmul.mubr.msk.f32.vlgmr.msra.gmra.mrb[6].mxu1 %vm495_vm3, %v583_v33 }
 0x461   :  { %v1733_v35 = vpop.f32.mrb[6].mxu0 }
 0x462   :  { %v662_v36 = vpop.f32.mrb[7].mxu0 }
 0x463   :  { %1757 = vmatprep.mubr.msk.f32.mxu0 %vm134_vm1, %v662_v36  ;;  %v1617_v36 = vld [vmem:[%s2253_s4 + $0x5] ss:$0 sm:$0xff] }
 0x464   :  { %1758 = vmatmul.mubr.msk.f32.vlgmr.msra.gmra.mrb[10].mxu0 %vm134_vm1, %v1733_v35 }
 0x465   :  { %1761 = vmatpush3.msra.mxu0 %v933_v34 }
 0x466   :  { %1765 = vmatprep.subr.mxu0 %v934_v37 }
 0x4c9   :  { %v1747_v38 = vpop.f32.mrb[8].mxu0 }
 0x4ca   :  { %v836_v39 = vpop.f32.mrb[9].mxu0 }
 0x4d0   :  { %v1740_v40 = vpop.f32.mrb[4].mxu1 }
 0x4d1   :  { %v749_v41 = vpop.f32.mrb[5].mxu1 }
 0x4d2   :  { %1762 = vmatprep.mubr.msk.f32.mxu0 %vm134_vm1, %v749_v41 }
 0x4d3   :  { %1763 = vmatmul.mubr.msk.f32.vlgmr.msra.gmra.mrb[10].mxu0 %vm134_vm1, %v1740_v40 }
 0x4d4   :  { %v1754_v43 = vpop.f32.mrb[6].mxu1  ;;  %1766 = vmatpush3.msra.mxu0 %v934_v37  ;;  %1767 = vmatprep.mubr.msk.f32.mxu0 %vm134_vm1, %v836_v39 }
 0x4d5   :  { %v923_v44 = vpop.f32.mrb[7].mxu1  ;;  %1770 = vmatprep.subr.mxu0 %v935_v42 }
 0x4db   :  { %1768 = vmatmul.mubr.msk.f32.vlgmr.msra.gmra.mrb[10].mxu0 %vm134_vm1, %v1747_v38 }
 0x4dc   :  { %1771 = vmatpush3.msra.mxu0 %v935_v42  ;;  %1772 = vmatprep.mubr.msk.f32.mxu0 %vm134_vm1, %v923_v44 }
 0x4e3   :  { %1773 = vmatmul.mubr.msk.f32.vlgmr.msra.gmra.mrb[10].mxu0 %vm134_vm1, %v1754_v43 }
 0x5b6   :  { %v1774_v46 = vpop.f32.mrb[10].mxu0 }
 0x5b7   :  { %v1272_v47 = vadd.f32 %v1774_v46, %v1607_v45  ;;  %v1251_v48 = vpop.f32.mrb[11].mxu0 }
 0x5b8   :  { %v1271_v49 = vadd.f32 %v1607_v45, %v1251_v48 }
 0x5b9   :  { %v1274_v50 = vadd.f32 %v1272_v47, %v2043_v7 }
 0x5ba   :  { %v1273_v51 = vadd.f32 %v1271_v49, %v2036_v5  ;;  %v1316_v5 = vld [vmem:[%s2252_s3] sm:$0xff] }
 0x5bb   :  { %v1278_v52 = vsel %vm32_vm0, %v1274_v50, 0.0  ;;  %v1845_v18 = vpack.c.bf16 %v1317_v63, %v1316_v5  ;;  %v1625_v63 = vld [vmem:[%s2253_s4 + $0x7] ss:$0 sm:$0xff] }
 0x5bc   :  { %1279 = vadd.xlane.f32.xlu0 %v1278_v52  ;;  %v1275_v53 = vsel %vm32_vm0, %v1273_v51, 0.0 }
 0x5bd   :  { %1276 = vadd.xlane.f32.xlu1 %v1275_v53  ;;  %1846 = vmatprep.subr.bf16.mxu1 %v1845_v18 }
 0x5be   :  { %1848 = vmatpush3.bf16.msra.mxu1 %v1845_v18 }
 0x5bf   :  { %1850 = vmatprep.subr.bf16.mxu1 %v1849_v22 }
 0x5c2   :  { %1852 = vmatpush3.bf16.msra.mxu1 %v1849_v22 }
 0x5c3   :  { %1855 = vmatprep.subr.msk.bf16.mxu1 %vm2191_vm5, %v1853_v3 }
 0x649   :  { %v1280_v54 = vpop.xlane.xlu0 %1279 }
 0x64a   :  { %v1283_v55 = vmul.f32 0.03125, %v1280_v54  ;;  %v1277_v56 = vpop.xlane.xlu1 %1276 }
 0x64b   :  { %v1282_v57 = vmul.f32 0.03125, %v1277_v56 }
 0x64c   :  { %v1285_v58 = vsub.f32 %v1274_v50, %v1283_v55 }
 0x64d   :  { %v1284_v59 = vsub.f32 %v1273_v51, %v1282_v57 }
 0x64e   :  { %v1287_v60 = vmul.f32 %v1285_v58, %v1285_v58  ;;  %v1302_v15 = vmul.f32 %v1608_v14, %v1285_v58 }
 0x64f   :  { %v1286_v61 = vmul.f32 %v1284_v59, %v1284_v59  ;;  %v1301_v17 = vmul.f32 %v1608_v14, %v1284_v59 }
 0x650   :  { %v1291_v62 = vsel %vm32_vm0, %v1287_v60, 0.0 }
 0x651   :  { %1292 = vadd.xlane.f32.xlu0 %v1291_v62  ;;  %v1288_v7 = vsel %vm32_vm0, %v1286_v61, 0.0  ;;  %v1624_v61 = vld [vmem:[%s2253_s4 + $0x6] ss:$0 sm:$0xff] }
 0x652   :  { %1289 = vadd.xlane.f32.xlu1 %v1288_v7 }
 0x6de   :  { %v1293_v6 = vpop.xlane.xlu0 %1292 }
 0x6df   :  { %v1295_v8 = vmul.f32 0.03125, %v1293_v6  ;;  %v1290_v9 = vpop.xlane.xlu1 %1289 }
 0x6e0   :  { %v1294_v10 = vmul.f32 0.03125, %v1290_v9 }
 0x6e1   :  { %v1304_v11 = vadd.f32 1e-06, %v1295_v8 }
 0x6e2   :  { %v1303_v12 = vadd.f32 1e-06, %v1294_v10 }
 0x6e3   :  { %1951 = vrsqrt.f32 %v1304_v11 }
 0x6e4   :  { %1953 = vrsqrt.f32 %v1303_v12 }
 0x6ed   :  { %v1952_v16 = vpop.eup %1951 }
 0x6ee   :  { %v1954_v20 = vpop.eup %1953  ;;  %v1308_v21 = vmul.f32 %v1952_v16, %v1302_v15 }
 0x6ef   :  { %v1307_v24 = vmul.f32 %v1954_v20, %v1301_v17 }
 0x6f0   :  { %v1315_v27 = vadd.f32 %v1609_v23, %v1308_v21 }
 0x6f1   :  { %v1314_v13 = vadd.f32 %v1609_v23, %v1307_v24 }
 0x6f3   :  { %1783 = vmatprep.mubr.msk.f32.mxu1 %vm32_vm0, %v1314_v13 }
 0x6f4   :  { %1784 = vmatmul.mubr.msk.f32.vlgmr.msra.gmra.mrb[8].mxu1 %vm32_vm0, %v1315_v27 }
 0x6f5   :  { %1858 = vmatpush3.bf16.xpose.msk.msra.mxu1 %vm2191_vm5, %v1853_v3 }
 0x6f6   :  { %1861 = vmatprep.subr.msk.bf16.mxu1 %vm2191_vm5, %v1859_v28 }
 0x6fd   :  { %1864 = vmatpush3.bf16.xpose.msk.msra.mxu1 %vm2191_vm5, %v1859_v28 }
 0x7c7   :  { %v1785_v30 = vpop.f32.mrb[8].mxu1 }
 0x7c8   :  { %v1403_v31 = vadd.f32 %v1785_v30, %v1610_v29  ;;  %v1397_v32 = vpop.f32.mrb[9].mxu1 }
 0x7c9   :  { %v1398_v33 = vadd.f32 %v1610_v29, %v1397_v32 }
 0x7ca   :  { %v1407_v35 = vmax.f32 %v1403_v31, 0.0 }
 0x7cb   :  { %v1406_v34 = vmax.f32 %v1398_v33, 0.0 }
 0x7cd   :  { %1794 = vmatprep.mubr.msk.f32.mxu1 %vm1418_vm4, %v1406_v34 }
 0x7ce   :  { %1795 = vmatmul.mubr.msk.f32.vlgmr.msra.gmra.mrb[10].mxu1 %vm1418_vm4, %v1407_v35 }
 0x8a1   :  { %v1796_v37 = vpop.f32.mrb[10].mxu1 }
 0x8a2   :  { %v1509_v38 = vadd.f32 %v1796_v37, %v1617_v36  ;;  %v1503_v39 = vpop.f32.mrb[11].mxu1 }
 0x8a3   :  { %v1504_v40 = vadd.f32 %v1617_v36, %v1503_v39 }
 0x8a4   :  { %v1513_v41 = vadd.f32 %v1509_v38, %v1315_v27 }
 0x8a5   :  { %v1512_v42 = vadd.f32 %v1504_v40, %v1314_v13 }
 0x8a6   :  { %v1517_v43 = vsel %vm32_vm0, %v1513_v41, 0.0 }
 0x8a7   :  { %1518 = vadd.xlane.f32.xlu0 %v1517_v43  ;;  %v1514_v44 = vsel %vm32_vm0, %v1512_v42, 0.0 }
 0x8a8   :  { %1515 = vadd.xlane.f32.xlu1 %v1514_v44 }
 0x934   :  { %v1519_v45 = vpop.xlane.xlu0 %1518 }
 0x935   :  { %v1521_v46 = vmul.f32 0.03125, %v1519_v45  ;;  %v1516_v47 = vpop.xlane.xlu1 %1515 }
 0x936   :  { %v1520_v48 = vmul.f32 0.03125, %v1516_v47 }
 0x937   :  { %v1523_v49 = vsub.f32 %v1513_v41, %v1521_v46 }
 0x938   :  { %v1522_v50 = vsub.f32 %v1512_v42, %v1520_v48 }
 0x939   :  { %v1525_v51 = vmul.f32 %v1523_v49, %v1523_v49  ;;  %v1540_v62 = vmul.f32 %v1624_v61, %v1523_v49 }
 0x93a   :  { %v1524_v52 = vmul.f32 %v1522_v50, %v1522_v50  ;;  %v1539_v5 = vmul.f32 %v1624_v61, %v1522_v50 }
 0x93b   :  { %v1529_v53 = vsel %vm32_vm0, %v1525_v51, 0.0 }
 0x93c   :  { %1530 = vadd.xlane.f32.xlu0 %v1529_v53  ;;  %v1526_v54 = vsel %vm32_vm0, %v1524_v52, 0.0 }
 0x93d   :  { %1527 = vadd.xlane.f32.xlu1 %v1526_v54 }
 0x9c9   :  { %v1531_v55 = vpop.xlane.xlu0 %1530 }
 0x9ca   :  { %v1533_v56 = vmul.f32 0.03125, %v1531_v55  ;;  %v1528_v57 = vpop.xlane.xlu1 %1527 }
 0x9cb   :  { %v1532_v58 = vmul.f32 0.03125, %v1528_v57 }
 0x9cc   :  { %v1542_v59 = vadd.f32 1e-06, %v1533_v56 }
 0x9cd   :  { %v1541_v60 = vadd.f32 1e-06, %v1532_v58 }
 0x9ce   :  { %1955 = vrsqrt.f32 %v1542_v59 }
 0x9cf   :  { %1957 = vrsqrt.f32 %v1541_v60 }
 0x9d8   :  { %v1956_v7 = vpop.eup %1955 }
 0x9d9   :  { %v1958_v0 = vpop.eup %1957  ;;  %v1546_v18 = vmul.f32 %v1956_v7, %v1540_v62 }
 0x9da   :  { %v1545_v1 = vmul.f32 %v1958_v0, %v1539_v5 }
 0x9db   :  { %v1553_v22 = vadd.f32 %v1625_v63, %v1546_v18 }
 0x9dc   :  { %v1552_v2 = vadd.f32 %v1625_v63, %v1545_v1 }
 0x9dd   :  { %1555 = vst.msk [vmem:[#allocation2 + $0x8] sm:$0xff] %vm32_vm0, %v1553_v22 }
 0x9de   :  { %1554 = vst.msk [vmem:[#allocation2] sm:$0xff] %vm32_vm0, %v1552_v2 }
 0x9df   :  { %1970 = shalt.err (!%p1967_p4)
}
 0x9e0   :  { %s1971_s26 = scalar_lea.hbm %s2254_s5, 256 }
 0x9e1   :  { %p1972_p5 = scmp.ne.s32.totalorder %s2254_s5, %s1971_s26  ;;  %p1975_p6 = scmp.lt.u32.totalorder %s1971_s26, %s2254_s5 }
 0x9e3   :  { %p1977_p7 = pnand %p1975_p6, %p1972_p5 }
 0x9e5   :  { %1980 = shalt.err (!%p1977_p7)
}
 0x9e6   :  { %s1989_s30 = smov 128   ;;  %s1990_s6 = smov 8  }
 0x9e7   :  { %1567 = dma.vmem_to_hbm [thread:$0]  %s1562_s2, 256, %s2254_s5, [#allocation3], %s1989_s30, %s1989_s30, %s1990_s6  }
 0x9e8   :  { %1981 = dma.done.wait [#allocation3], 256  }
 0x9e9   :  { %1982 = vsyncadd [#allocation3], 4294967040 }
 0x9ea   :  { %1571 = vsyncpa [#allocation3], 1 }

</bundles_post_ra>
